<compile_context>
chip_gen: v7x
topology: tpu7x:2x2x1
jax: 0.10.0
libtpu: 0.0.40
codegen_flags: <defaults>
</compile_context>

<pallas_src>
import functools
import math

import jax
import jax.numpy as jnp
from jax.experimental import pallas as pl
from jax.experimental.pallas import tpu as pltpu

EPS = 1e-6


def layernorm_kernel(alpha_ref, bias_ref, x_ref, o_ref, *, h, k):
    """x_ref/o_ref: (block_rows, k*h) lane-dense tile; k original rows of width
    h are packed along the lane axis.  alpha/bias: (1,) scalars in SMEM."""
    x = x_ref[...].astype(jnp.float32)          # dense vector loads
    alpha = alpha_ref[0].astype(jnp.float32)
    bias = bias_ref[0].astype(jnp.float32)

    inv_h = 1.0 / h
    # torch.Tensor.std() is the unbiased estimator (ddof=1).  (h==1 would be
    # NaN in torch; we just avoid the Python ZeroDivisionError here.)
    inv_hm1 = 1.0 / (h - 1) if h > 1 else 0.0

    for c in range(k):                          # k is a small static constant
        xc = x[:, c * h:(c + 1) * h]            # (block_rows, h) static slice
        # Two-pass mean/var kept for numerical robustness (single-pass fusion
        # is optional per review); reductions are exact f32.
        mean = jnp.sum(xc, axis=-1, keepdims=True) * inv_h
        diff = xc - mean
        var = jnp.sum(diff * diff, axis=-1, keepdims=True) * inv_hm1
        # One reciprocal per row, then broadcast-multiply (no per-element
        # divide).  approx=False keeps full f32 accuracy (approx=True's EUP
        # error would exceed the 1e-5 tolerance vs. the PyTorch reference).
        inv_std = pl.reciprocal(jnp.sqrt(var) + EPS, approx=False)
        o_ref[:, c * h:(c + 1) * h] = (alpha * diff * inv_std + bias).astype(o_ref.dtype)


def layer_normalization(x, alpha, bias, *, target_tile_bytes=4 * 1024 * 1024):
    """PyTorch LayerNormalization.forward for x of shape (..., H)."""
    orig_shape = x.shape
    orig_dtype = x.dtype
    H = orig_shape[-1]
    rows = math.prod(orig_shape[:-1]) if len(orig_shape) > 1 else 1
    x2 = x.reshape(rows, H)

    # Lane-dense folding: if H is lane-sparse (H < 128 and divides 128), pack
    # k = 128 // H consecutive rows into the 128-lane axis.  This is a free
    # row-major reshape on the wrapper side; it makes DMA tiles and stores
    # unmasked (the biggest single lever per the perf review).
    if H < 128 and 128 % H == 0:
        k = 128 // H
    else:
        k = 1  # H >= 128 (or odd small H): last dim already (mostly) lane-dense
    W = k * H

    itemsize = jnp.dtype(orig_dtype).itemsize
    # Sublane packing multiple: f32 -> 8, bf16 -> 16, int8/fp8 -> 32.
    row_mult = max(8, 32 // itemsize)

    # Largest row tile that fits the per-buffer VMEM budget (kernel is pure
    # HBM-bandwidth bound; big tiles amortize the ~0.35 us per-grid-step cost).
    # Budget against the f32 in-kernel temporaries (W * 4 bytes per row).
    br = max(row_mult, target_tile_bytes // max(1, W * 4))
    br = max(row_mult, (br // row_mult) * row_mult)
    folded_rows = pl.cdiv(rows, k)
    # Keep at least 2 grid steps so v7x's two TensorCores both get work
    # (costs nothing on single-TC v5e/v6e).
    while br > row_mult and pl.cdiv(folded_rows, br) < 2:
        br = max(row_mult, ((br // 2) // row_mult) * row_mult)
    block_rows = br

    grid_steps = pl.cdiv(folded_rows, block_rows)
    rows_pad = grid_steps * block_rows * k
    if rows_pad != rows:
        # Pad instead of asserting divisibility; padded zero rows are harmless
        # (eps keeps them finite) and are sliced off below.
        x2 = jnp.pad(x2, ((0, rows_pad - rows), (0, 0)))
    x3 = x2.reshape(rows_pad // k, W)

    # Explicit scoped-VMEM limit: 2 (in+out) x 2 (double buffer) tiles plus the
    # f32 temporaries.  Floor 32 MiB (raises v5e's 16 MiB default), cap 48 MiB
    # (leaves headroom inside v7x's 64 MiB physical VMEM).
    tile_bytes = block_rows * W * itemsize
    vmem_bytes = 4 * tile_bytes + 6 * block_rows * W * 4 + (4 << 20)
    vmem_limit = int(min(max(vmem_bytes, 32 << 20), 48 << 20))

    kernel = functools.partial(layernorm_kernel, h=H, k=k)

    out = pl.pallas_call(
        kernel,
        out_shape=jax.ShapeDtypeStruct((rows_pad // k, W), orig_dtype),
        grid_spec=pltpu.PrefetchScalarGridSpec(
            num_scalar_prefetch=0,
            grid=(grid_steps,),
            in_specs=[
                pl.BlockSpec(memory_space=pltpu.SMEM),        # alpha (1,)
                pl.BlockSpec(memory_space=pltpu.SMEM),        # bias  (1,)
                pl.BlockSpec((block_rows, W), lambda i: (i, 0)),
            ],
            out_specs=pl.BlockSpec((block_rows, W), lambda i: (i, 0)),
        ),
        compiler_params=pltpu.CompilerParams(
            dimension_semantics=("parallel",),
            vmem_limit_bytes=vmem_limit,
        ),
    )(alpha, bias, x3)

    out = out.reshape(rows_pad, H)[:rows]
    return out.reshape(orig_shape)


def residual_connection(x, sublayer, alpha, bias, *, dropout_rate=0.0,
                        deterministic=True, rng_key=None):
    """PyTorch ResidualConnection.forward: x + dropout(sublayer(norm(x)))."""
    y = sublayer(layer_normalization(x, alpha, bias))
    if (not deterministic) and dropout_rate > 0.0:
        # TODO(synk): training-mode dropout + residual add could be fused into a
        # second elementwise Pallas kernel once the sublayer output layout is known.
        keep = 1.0 - dropout_rate
        mask = jax.random.bernoulli(rng_key, keep, y.shape)
        y = jnp.where(mask, y / keep, jnp.zeros_like(y)).astype(y.dtype)
    return x + y


if __name__ == "__main__":
    key = jax.random.PRNGKey(0)
    batch, seq, hidden = 2, 8, 32
    x = jax.random.normal(key, (batch, seq, hidden), dtype=jnp.float32)

    # nn.Parameter(torch.ones(1)) / nn.Parameter(torch.zeros(1))
    alpha = jnp.ones((1,), dtype=jnp.float32)
    bias = jnp.zeros((1,), dtype=jnp.float32)

    def ln_ref(v):
        mean = jnp.mean(v, axis=-1, keepdims=True)
        std = jnp.sqrt(jnp.sum((v - mean) ** 2, axis=-1, keepdims=True)
                       / (v.shape[-1] - 1))          # unbiased, like torch.std
        return alpha[0] * (v - mean) / (std + EPS) + bias[0]

    # ResidualConnection with an identity sublayer, inference mode (dropout off).
    sublayer = lambda t: t
    out = residual_connection(x, sublayer, alpha, bias,
                              dropout_rate=0.1, deterministic=True)
    out = jax.block_until_ready(out)
    ref = x + ln_ref(x)
    assert out.shape == x.shape
    assert jnp.allclose(out, ref, atol=1e-5, rtol=1e-5)

    # Second shape: rows not a multiple of the tile (exercises padding) and
    # H >= 128 (un-folded path).
    x_b = jax.random.normal(jax.random.PRNGKey(1), (3, 5, 256), dtype=jnp.float32)
    out_b = jax.block_until_ready(layer_normalization(x_b, alpha, bias))
    assert out_b.shape == x_b.shape
    assert jnp.allclose(out_b, ln_ref(x_b), atol=1e-5, rtol=1e-5)

    print("KERNEL_OK")
</pallas_src>

<mosaic_0001>
module attributes {stable_mosaic.version = 11 : i64} {
  func.func @layernorm_kernel(%arg0: i32, %arg1: memref<1xf32, #tpu.memory_space<smem>>, %arg2: memref<1xf32, #tpu.memory_space<smem>>, %arg3: memref<8x128xf32, #tpu.memory_space<vmem>>, %arg4: memref<8x128xf32, #tpu.memory_space<vmem>>) attributes {dimension_semantics = [#tpu.dimension_semantics<parallel>], iteration_bounds = array<i64: 1>, scalar_prefetch = 0 : i64, scratch_operands = 0 : i64, tpu.core_type = #tpu.core_type<tc>, window_params = [{transform_indices = @transform_0, window_bounds = array<i64: 1>}, {transform_indices = @transform_1, window_bounds = array<i64: 1>}, {transform_indices = @transform_2, window_bounds = array<i64: 8, 128>}, {transform_indices = @transform_3, window_bounds = array<i64: 8, 128>}]} {
    %c0 = arith.constant 0 : index
    %c0_0 = arith.constant 0 : index
    %0 = vector.load %arg3[%c0, %c0_0] : memref<8x128xf32, #tpu.memory_space<vmem>>, vector<8x128xf32>
    %c0_1 = arith.constant 0 : index
    %1 = memref.load %arg1[%c0_1] : memref<1xf32, #tpu.memory_space<smem>>
    %c0_2 = arith.constant 0 : index
    %2 = memref.load %arg2[%c0_2] : memref<1xf32, #tpu.memory_space<smem>>
    %3 = vector.extract_strided_slice %0 {offsets = [0, 0], sizes = [8, 32], strides = [1, 1]} : vector<8x128xf32> to vector<8x32xf32>
    %cst = arith.constant dense<0.000000e+00> : vector<8xf32>
    %4 = vector.multi_reduction <add>, %3, %cst [1] : vector<8x32xf32> to vector<8xf32>
    %5 = vector.shape_cast %4 : vector<8xf32> to vector<8x1xf32>
    %cst_3 = arith.constant 3.125000e-02 : f32
    %6 = vector.broadcast %cst_3 : f32 to vector<8x1xf32>
    %7 = arith.mulf %5, %6 : vector<8x1xf32>
    %8 = vector.broadcast %7 : vector<8x1xf32> to vector<8x32xf32>
    %9 = arith.subf %3, %8 : vector<8x32xf32>
    %10 = arith.mulf %9, %9 : vector<8x32xf32>
    %cst_4 = arith.constant dense<0.000000e+00> : vector<8xf32>
    %11 = vector.multi_reduction <add>, %10, %cst_4 [1] : vector<8x32xf32> to vector<8xf32>
    %12 = vector.shape_cast %11 : vector<8xf32> to vector<8x1xf32>
    %cst_5 = arith.constant 0.0322580636 : f32
    %13 = vector.broadcast %cst_5 : f32 to vector<8x1xf32>
    %14 = arith.mulf %12, %13 : vector<8x1xf32>
    %15 = math.sqrt %14 : vector<8x1xf32>
    %cst_6 = arith.constant 9.99999997E-7 : f32
    %16 = vector.broadcast %cst_6 : f32 to vector<8x1xf32>
    %17 = arith.addf %15, %16 : vector<8x1xf32>
    %18 = tpu.reciprocal %17 : vector<8x1xf32> -> vector<8x1xf32>
    %19 = vector.broadcast %1 : f32 to vector<8x32xf32>
    %20 = arith.mulf %19, %9 : vector<8x32xf32>
    %21 = vector.broadcast %18 : vector<8x1xf32> to vector<8x32xf32>
    %22 = arith.mulf %20, %21 : vector<8x32xf32>
    %23 = vector.broadcast %2 : f32 to vector<8x32xf32>
    %24 = arith.addf %22, %23 : vector<8x32xf32>
    %c0_7 = arith.constant 0 : index
    %c0_8 = arith.constant 0 : index
    %25 = vector.load %arg4[%c0_7, %c0_8] : memref<8x128xf32, #tpu.memory_space<vmem>>, vector<8x32xf32>
    tpu.vector_store %arg4[%c0_7, %c0_8], %24 {strides = array<i32>} : memref<8x128xf32, #tpu.memory_space<vmem>>, vector<8x32xf32>,
    %26 = vector.extract_strided_slice %0 {offsets = [0, 32], sizes = [8, 32], strides = [1, 1]} : vector<8x128xf32> to vector<8x32xf32>
    %cst_9 = arith.constant dense<0.000000e+00> : vector<8xf32>
    %27 = vector.multi_reduction <add>, %26, %cst_9 [1] : vector<8x32xf32> to vector<8xf32>
    %28 = vector.shape_cast %27 : vector<8xf32> to vector<8x1xf32>
    %cst_10 = arith.constant 3.125000e-02 : f32
    %29 = vector.broadcast %cst_10 : f32 to vector<8x1xf32>
    %30 = arith.mulf %28, %29 : vector<8x1xf32>
    %31 = vector.broadcast %30 : vector<8x1xf32> to vector<8x32xf32>
    %32 = arith.subf %26, %31 : vector<8x32xf32>
    %33 = arith.mulf %32, %32 : vector<8x32xf32>
    %cst_11 = arith.constant dense<0.000000e+00> : vector<8xf32>
    %34 = vector.multi_reduction <add>, %33, %cst_11 [1] : vector<8x32xf32> to vector<8xf32>
    %35 = vector.shape_cast %34 : vector<8xf32> to vector<8x1xf32>
    %cst_12 = arith.constant 0.0322580636 : f32
    %36 = vector.broadcast %cst_12 : f32 to vector<8x1xf32>
    %37 = arith.mulf %35, %36 : vector<8x1xf32>
    %38 = math.sqrt %37 : vector<8x1xf32>
    %cst_13 = arith.constant 9.99999997E-7 : f32
    %39 = vector.broadcast %cst_13 : f32 to vector<8x1xf32>
    %40 = arith.addf %38, %39 : vector<8x1xf32>
    %41 = tpu.reciprocal %40 : vector<8x1xf32> -> vector<8x1xf32>
    %42 = vector.broadcast %1 : f32 to vector<8x32xf32>
    %43 = arith.mulf %42, %32 : vector<8x32xf32>
    %44 = vector.broadcast %41 : vector<8x1xf32> to vector<8x32xf32>
    %45 = arith.mulf %43, %44 : vector<8x32xf32>
    %46 = vector.broadcast %2 : f32 to vector<8x32xf32>
    %47 = arith.addf %45, %46 : vector<8x32xf32>
    %c0_14 = arith.constant 0 : index
    %c32 = arith.constant 32 : index
    %48 = vector.load %arg4[%c0_14, %c32] : memref<8x128xf32, #tpu.memory_space<vmem>>, vector<8x32xf32>
    tpu.vector_store %arg4[%c0_14, %c32], %47 {strides = array<i32>} : memref<8x128xf32, #tpu.memory_space<vmem>>, vector<8x32xf32>,
    %49 = vector.extract_strided_slice %0 {offsets = [0, 64], sizes = [8, 32], strides = [1, 1]} : vector<8x128xf32> to vector<8x32xf32>
    %cst_15 = arith.constant dense<0.000000e+00> : vector<8xf32>
    %50 = vector.multi_reduction <add>, %49, %cst_15 [1] : vector<8x32xf32> to vector<8xf32>
    %51 = vector.shape_cast %50 : vector<8xf32> to vector<8x1xf32>
    %cst_16 = arith.constant 3.125000e-02 : f32
    %52 = vector.broadcast %cst_16 : f32 to vector<8x1xf32>
    %53 = arith.mulf %51, %52 : vector<8x1xf32>
    %54 = vector.broadcast %53 : vector<8x1xf32> to vector<8x32xf32>
    %55 = arith.subf %49, %54 : vector<8x32xf32>
    %56 = arith.mulf %55, %55 : vector<8x32xf32>
    %cst_17 = arith.constant dense<0.000000e+00> : vector<8xf32>
    %57 = vector.multi_reduction <add>, %56, %cst_17 [1] : vector<8x32xf32> to vector<8xf32>
    %58 = vector.shape_cast %57 : vector<8xf32> to vector<8x1xf32>
    %cst_18 = arith.constant 0.0322580636 : f32
    %59 = vector.broadcast %cst_18 : f32 to vector<8x1xf32>
    %60 = arith.mulf %58, %59 : vector<8x1xf32>
    %61 = math.sqrt %60 : vector<8x1xf32>
    %cst_19 = arith.constant 9.99999997E-7 : f32
    %62 = vector.broadcast %cst_19 : f32 to vector<8x1xf32>
    %63 = arith.addf %61, %62 : vector<8x1xf32>
    %64 = tpu.reciprocal %63 : vector<8x1xf32> -> vector<8x1xf32>
    %65 = vector.broadcast %1 : f32 to vector<8x32xf32>
    %66 = arith.mulf %65, %55 : vector<8x32xf32>
    %67 = vector.broadcast %64 : vector<8x1xf32> to vector<8x32xf32>
    %68 = arith.mulf %66, %67 : vector<8x32xf32>
    %69 = vector.broadcast %2 : f32 to vector<8x32xf32>
    %70 = arith.addf %68, %69 : vector<8x32xf32>
    %c0_20 = arith.constant 0 : index
    %c64 = arith.constant 64 : index
    %71 = vector.load %arg4[%c0_20, %c64] : memref<8x128xf32, #tpu.memory_space<vmem>>, vector<8x32xf32>
    tpu.vector_store %arg4[%c0_20, %c64], %70 {strides = array<i32>} : memref<8x128xf32, #tpu.memory_space<vmem>>, vector<8x32xf32>,
    %72 = vector.extract_strided_slice %0 {offsets = [0, 96], sizes = [8, 32], strides = [1, 1]} : vector<8x128xf32> to vector<8x32xf32>
    %cst_21 = arith.constant dense<0.000000e+00> : vector<8xf32>
    %73 = vector.multi_reduction <add>, %72, %cst_21 [1] : vector<8x32xf32> to vector<8xf32>
    %74 = vector.shape_cast %73 : vector<8xf32> to vector<8x1xf32>
    %cst_22 = arith.constant 3.125000e-02 : f32
    %75 = vector.broadcast %cst_22 : f32 to vector<8x1xf32>
    %76 = arith.mulf %74, %75 : vector<8x1xf32>
    %77 = vector.broadcast %76 : vector<8x1xf32> to vector<8x32xf32>
    %78 = arith.subf %72, %77 : vector<8x32xf32>
    %79 = arith.mulf %78, %78 : vector<8x32xf32>
    %cst_23 = arith.constant dense<0.000000e+00> : vector<8xf32>
    %80 = vector.multi_reduction <add>, %79, %cst_23 [1] : vector<8x32xf32> to vector<8xf32>
    %81 = vector.shape_cast %80 : vector<8xf32> to vector<8x1xf32>
    %cst_24 = arith.constant 0.0322580636 : f32
    %82 = vector.broadcast %cst_24 : f32 to vector<8x1xf32>
    %83 = arith.mulf %81, %82 : vector<8x1xf32>
    %84 = math.sqrt %83 : vector<8x1xf32>
    %cst_25 = arith.constant 9.99999997E-7 : f32
    %85 = vector.broadcast %cst_25 : f32 to vector<8x1xf32>
    %86 = arith.addf %84, %85 : vector<8x1xf32>
    %87 = tpu.reciprocal %86 : vector<8x1xf32> -> vector<8x1xf32>
    %88 = vector.broadcast %1 : f32 to vector<8x32xf32>
    %89 = arith.mulf %88, %78 : vector<8x32xf32>
    %90 = vector.broadcast %87 : vector<8x1xf32> to vector<8x32xf32>
    %91 = arith.mulf %89, %90 : vector<8x32xf32>
    %92 = vector.broadcast %2 : f32 to vector<8x32xf32>
    %93 = arith.addf %91, %92 : vector<8x32xf32>
    %c0_26 = arith.constant 0 : index
    %c96 = arith.constant 96 : index
    %94 = vector.load %arg4[%c0_26, %c96] : memref<8x128xf32, #tpu.memory_space<vmem>>, vector<8x32xf32>
    tpu.vector_store %arg4[%c0_26, %c96], %93 {strides = array<i32>} : memref<8x128xf32, #tpu.memory_space<vmem>>, vector<8x32xf32>,
    return
  }
  func.func @transform_0(%arg0: i32) -> i32 {
    %c0_i32 = arith.constant 0 : i32
    %c0_i32_0 = arith.constant 0 : i32
    return %c0_i32 : i32
  }
  func.func @transform_1(%arg0: i32) -> i32 {
    %c0_i32 = arith.constant 0 : i32
    %c0_i32_0 = arith.constant 0 : i32
    return %c0_i32 : i32
  }
  func.func @transform_2(%arg0: i32) -> (i32, i32) {
    %c0_i32 = arith.constant 0 : i32
    %c0_i32_0 = arith.constant 0 : i32
    return %arg0, %c0_i32 : i32, i32
  }
  func.func @transform_3(%arg0: i32) -> (i32, i32) {
    %c0_i32 = arith.constant 0 : i32
    %c0_i32_0 = arith.constant 0 : i32
    return %arg0, %c0_i32 : i32, i32
  }
}

</mosaic_0001>

<bundles_post_ra>
// kernel: tpu_custom_call.1
= control target key start
LH: loop header
LB: loop body
LE: loop exit
PB: predicated region body
PF: predicated region fallthrough
CT: control target
= control target key end

     0   :  { %10 = vsyncpa [#allocation5], 0  ;;  %s311_s0 = inlined_call_operand.<no memory space> [shape: f32[1], index: 0, kind: input, shape index: {}]   ;;  %s312_s1 = inlined_call_operand.<no memory space> [shape: f32[1], index: 1, kind: input, shape index: {}]   ;;  %s313_s2 = inlined_call_operand.hbm [shape: f32[8,128], index: 2, kind: input, shape index: {}]   ;;  %s314_s3 = inlined_call_operand.hbm [shape: f32[8,128], index: 3, kind: output, shape index: {}]  }
   0x1   :  { %11 = vsyncpa [#allocation6], 0  ;;  %s236_s12 = smov [#allocation4]   ;;  %s188_s16 = scalar_lea.hbm %s313_s2, 128 }
   0x2   :  { %s22_s13 = sshll.u32 %s236_s12, 4  ;;  %p189_p0 = scmp.ne.s32.totalorder %s313_s2, %s188_s16  ;;  %s23_s13 = int_to_ptr.vmem [resolvable:$true] %s22_s13 }
   0x3   :  { %p192_p1 = scmp.lt.u32.totalorder %s188_s16, %s313_s2 }
   0x5   :  { %p194_p2 = pnand %p192_p1, %p189_p0 }
   0x7   :  { %197 = shalt.err (!%p194_p2)
}
   0x8   :  { %s198_s21 = scalar_lea.vmem %s23_s13, 128  ;;  %p203_p4 = scmp.lt.s32.totalorder %s23_s13, %s23_s13 }
   0x9   :  { %p199_p3 = scmp.ne.s32.totalorder %s23_s13, %s198_s21  ;;  %p204_p5 = scmp.lt.s32.totalorder %s198_s21, %s198_s21 }
   0xb   :  { %p205_p6 = por %p204_p5, %p203_p4 }
   0xd   :  { %p206_p7 = pnand %p205_p6, %p199_p3 }
   0xf   :  { %209 = shalt.err (!%p206_p7)
}
  0x10   :  { %25 = dma.hbm_to_vmem [thread:$0]  %s313_s2, 128, %s23_s13, [#allocation5]  }
  0x11   :  { %232 = dma.done.wait [#allocation5], 128  }
  0x12   :  { %233 = vsyncadd [#allocation5], 4294967168  ;;  %v29_v0 = vld [vmem:[#allocation4] sm:$0xff]  ;;  %s237_s24 = smov 96   ;;  %s238_s25 = smov 32   ;;  %vm32_vm0 = vcmask 261120   ;;  %v52_v10 = vstv %s311_s0  ;;  %v55_v45 = vstv %s312_s1 }
  0x13   :  { %59 = vrot.lane.b32.xlu0 %v29_v0, %s237_s24  ;;  %121 = vrot.lane.b32.xlu1 %v29_v0, %s238_s25  ;;  %s239_s26 = smov 64   ;;  %v33_v3 = vsel %vm32_vm0, %v29_v0, 0.0  ;;  %vm88_vm9 = vcmask 523520   ;;  %vm119_vm10 = vcmask 785920   ;;  %s240_s1 = smov [#allocation7]   ;;  %vm150_vm11 = vcmask 1048320  }
  0x14   :  { %s158_s29 = sshll.u32 %s240_s1, 4  ;;  %s159_s29 = int_to_ptr.vmem [resolvable:$true] %s158_s29 }
  0x15   :  { %s210_s30 = scalar_lea.vmem %s159_s29, 128  ;;  %p215_p9 = scmp.lt.s32.totalorder %s159_s29, %s159_s29 }
  0x16   :  { %p211_p8 = scmp.ne.s32.totalorder %s159_s29, %s210_s30  ;;  %p216_p10 = scmp.lt.s32.totalorder %s210_s30, %s210_s30 }
  0x17   :  { %90 = vrot.lane.b32.xlu0 %v29_v0, %s239_s26 }
  0x18   :  { %p217_p11 = por %p216_p10, %p215_p9 }
  0x1a   :  { %p218_p12 = pnand %p217_p11, %p211_p8 }
  0x85   :  { %v60_v1 = vpop.permute.xlu0 %59  ;;  %v122_v5 = vpop.permute.xlu1 %121 }
  0x86   :  { %v62_v2 = vsel %vm32_vm0, %v60_v1, 0.0  ;;  %v124_v7 = vsel %vm32_vm0, %v122_v5, 0.0 }
  0x87   :  { %63 = vadd.xlane.f32.xlu1 %v62_v2 }
  0x89   :  { %v91_v4 = vpop.permute.xlu0 %90 }
  0x8a   :  { %v93_v6 = vsel %vm32_vm0, %v91_v4, 0.0 }
  0x8b   :  { %94 = vadd.xlane.f32.xlu0 %v93_v6  ;;  %34 = vadd.xlane.f32.xlu1 %v33_v3 }
  0x8f   :  { %125 = vadd.xlane.f32.xlu0 %v124_v7 }
 0x114   :  { %v64_v8 = vpop.xlane.xlu1 %63 }
 0x115   :  { %v65_v9 = vmul.f32 0.03125, %v64_v8 }
 0x117   :  { %v66_v11 = vsub.f32 %v29_v0, %v65_v9 }
 0x118   :  { %v95_v12 = vpop.xlane.xlu0 %94  ;;  %v35_v24 = vpop.xlane.xlu1 %34 }
 0x119   :  { %v281_v13 = vmul.f32 %v66_v11, %v52_v10  ;;  %v96_v14 = vmul.f32 0.03125, %v95_v12  ;;  %v67_v15 = vmul.f32 %v66_v11, %v66_v11  ;;  %v36_v25 = vmul.f32 0.03125, %v35_v24 }
 0x11b   :  { %v97_v16 = vsub.f32 %v29_v0, %v96_v14  ;;  %69 = vrot.lane.b32.xlu0 %v67_v15, %s237_s24  ;;  %v37_v26 = vsub.f32 %v29_v0, %v36_v25 }
 0x11c   :  { %v126_v17 = vpop.xlane.xlu0 %125 }
 0x11d   :  { %v283_v18 = vmul.f32 %v97_v16, %v52_v10  ;;  %v127_v19 = vmul.f32 0.03125, %v126_v17  ;;  %v98_v20 = vmul.f32 %v97_v16, %v97_v16  ;;  %v38_v27 = vmul.f32 %v37_v26, %v37_v26 }
 0x11e   :  { %v53_v43 = vmul.f32 %v52_v10, %v37_v26 }
 0x11f   :  { %v128_v21 = vsub.f32 %v29_v0, %v127_v19  ;;  %100 = vrot.lane.b32.xlu1 %v98_v20, %s239_s26  ;;  %v39_v28 = vsel %vm32_vm0, %v38_v27, 0.0 }
 0x121   :  { %v285_v22 = vmul.f32 %v128_v21, %v52_v10  ;;  %v129_v23 = vmul.f32 %v128_v21, %v128_v21 }
 0x123   :  { %131 = vrot.lane.b32.xlu1 %v129_v23, %s238_s25 }
 0x13a   :  { %40 = vadd.xlane.f32.xlu0 %v39_v28 }
 0x18d   :  { %v70_v29 = vpop.permute.xlu0 %69 }
 0x18e   :  { %v72_v30 = vsel %vm32_vm0, %v70_v29, 0.0 }
 0x18f   :  { %73 = vadd.xlane.f32.xlu1 %v72_v30 }
 0x191   :  { %v101_v31 = vpop.permute.xlu1 %100 }
 0x192   :  { %v103_v32 = vsel %vm32_vm0, %v101_v31, 0.0 }
 0x193   :  { %104 = vadd.xlane.f32.xlu0 %v103_v32 }
 0x195   :  { %v132_v33 = vpop.permute.xlu1 %131 }
 0x196   :  { %v134_v34 = vsel %vm32_vm0, %v132_v33, 0.0 }
 0x197   :  { %135 = vadd.xlane.f32.xlu0 %v134_v34 }
 0x1c7   :  { %v41_v35 = vpop.xlane.xlu0 %40 }
 0x1c8   :  { %v42_v36 = vmul.f32 0.032258064, %v41_v35 }
 0x1ca   :  { %172 = vrsqrt.f32 %v42_v36  ;;  %vm45_vm1 = vcmp.eq.f32.partialorder %v42_v36, inf  ;;  %v48_v38 = vand.u32 2147483648, %v42_v36  ;;  %vm47_vm2 = vcmp.eq.f32.partialorder %v42_v36, 0.0 }
 0x1d4   :  { %v173_v37 = vpop.eup %172 }
 0x1d5   :  { %v44_v39 = vmul.f32 %v173_v37, %v42_v36 }
 0x1d7   :  { %v46_v40 = vsel %vm45_vm1, %v42_v36, %v44_v39 }
 0x1d8   :  { %v49_v41 = vsel %vm47_vm2, %v48_v38, %v46_v40 }
 0x1d9   :  { %v50_v42 = vadd.f32 1e-06, %v49_v41 }
 0x1db   :  { %174 = vrcp.f32 %v50_v42 }
 0x1e5   :  { %v175_v44 = vpop.eup %174 }
 0x1e6   :  { %v54_v46 = vmul.f32 %v175_v44, %v53_v43 }
 0x1e8   :  { %v56_v47 = vadd.f32 %v55_v45, %v54_v46 }
 0x1ea   :  { %57 = vst.msk [vmem:[#allocation7] sm:$0xff] %vm32_vm0, %v56_v47 }
 0x21c   :  { %v74_v48 = vpop.xlane.xlu1 %73 }
 0x21d   :  { %v75_v49 = vmul.f32 0.032258064, %v74_v48 }
 0x21f   :  { %176 = vrsqrt.f32 %v75_v49  ;;  %vm78_vm3 = vcmp.eq.f32.partialorder %v75_v49, inf  ;;  %v81_v56 = vand.u32 2147483648, %v75_v49  ;;  %vm80_vm4 = vcmp.eq.f32.partialorder %v75_v49, 0.0 }
 0x220   :  { %v105_v50 = vpop.xlane.xlu0 %104 }
 0x221   :  { %v106_v51 = vmul.f32 0.032258064, %v105_v50 }
 0x223   :  { %178 = vrsqrt.f32 %v106_v51  ;;  %vm109_vm5 = vcmp.eq.f32.partialorder %v106_v51, inf  ;;  %v112_v62 = vand.u32 2147483648, %v106_v51  ;;  %vm111_vm6 = vcmp.eq.f32.partialorder %v106_v51, 0.0 }
 0x224   :  { %v136_v52 = vpop.xlane.xlu0 %135 }
 0x225   :  { %v137_v53 = vmul.f32 0.032258064, %v136_v52 }
 0x227   :  { %180 = vrsqrt.f32 %v137_v53  ;;  %vm140_vm7 = vcmp.eq.f32.partialorder %v137_v53, inf  ;;  %v143_v4 = vand.u32 2147483648, %v137_v53  ;;  %vm142_vm8 = vcmp.eq.f32.partialorder %v137_v53, 0.0 }
 0x229   :  { %v177_v54 = vpop.eup %176 }
 0x22a   :  { %v77_v55 = vmul.f32 %v177_v54, %v75_v49 }
 0x22c   :  { %v79_v57 = vsel %vm78_vm3, %v75_v49, %v77_v55 }
 0x22d   :  { %v179_v58 = vpop.eup %178  ;;  %v82_v59 = vsel %vm80_vm4, %v81_v56, %v79_v57 }
 0x22e   :  { %v83_v60 = vadd.f32 1e-06, %v82_v59  ;;  %v108_v61 = vmul.f32 %v179_v58, %v106_v51 }
 0x230   :  { %182 = vrcp.f32 %v83_v60  ;;  %v110_v63 = vsel %vm109_vm5, %v106_v51, %v108_v61 }
 0x231   :  { %v181_v0 = vpop.eup %180  ;;  %v113_v1 = vsel %vm111_vm6, %v112_v62, %v110_v63 }
 0x232   :  { %v114_v2 = vadd.f32 1e-06, %v113_v1  ;;  %v139_v3 = vmul.f32 %v181_v0, %v137_v53 }
 0x234   :  { %184 = vrcp.f32 %v114_v2  ;;  %v141_v5 = vsel %vm140_vm7, %v137_v53, %v139_v3 }
 0x235   :  { %v144_v6 = vsel %vm142_vm8, %v143_v4, %v141_v5 }
 0x236   :  { %v145_v7 = vadd.f32 1e-06, %v144_v6 }
 0x238   :  { %186 = vrcp.f32 %v145_v7 }
 0x23a   :  { %v183_v8 = vpop.eup %182 }
 0x23b   :  { %v86_v9 = vmul.f32 %v183_v8, %v281_v13 }
 0x23d   :  { %v87_v10 = vadd.f32 %v86_v9, %v55_v45 }
 0x23e   :  { %v185_v11 = vpop.eup %184 }
 0x23f   :  { %89 = vst.msk [vmem:[#allocation7] sm:$0xff] %vm88_vm9, %v87_v10  ;;  %v117_v12 = vmul.f32 %v185_v11, %v283_v18 }
 0x241   :  { %v118_v14 = vadd.f32 %v117_v12, %v55_v45 }
 0x242   :  { %v187_v15 = vpop.eup %186 }
 0x243   :  { %120 = vst.msk [vmem:[#allocation7] sm:$0xff] %vm119_vm10, %v118_v14  ;;  %v148_v16 = vmul.f32 %v187_v15, %v285_v22 }
 0x245   :  { %v149_v17 = vadd.f32 %v148_v16, %v55_v45 }
 0x247   :  { %151 = vst.msk [vmem:[#allocation7] sm:$0xff] %vm150_vm11, %v149_v17 }
 0x248   :  { %221 = shalt.err (!%p218_p12)
}
 0x249   :  { %s222_s6 = scalar_lea.hbm %s314_s3, 128 }
 0x24a   :  { %p223_p13 = scmp.ne.s32.totalorder %s314_s3, %s222_s6  ;;  %p226_p0 = scmp.lt.u32.totalorder %s222_s6, %s314_s3 }
 0x24c   :  { %p228_p1 = pnand %p226_p0, %p223_p13 }
 0x24e   :  { %231 = shalt.err (!%p228_p1)
}
 0x24f   :  { %161 = dma.vmem_to_hbm [thread:$0]  %s159_s29, 128, %s314_s3, [#allocation6]  }
 0x250   :  { %234 = dma.done.wait [#allocation6], 128  }
 0x251   :  { %235 = vsyncadd [#allocation6], 4294967168 }
 0x252   :  { %165 = vsyncpa [#allocation5], 1 }
 0x253   :  { %166 = vsyncpa [#allocation6], 1 }

</bundles_post_ra>
